<compile_context>
chip_gen: v5e
topology: v5e:2x2
jax: 0.10.0
libtpu: 0.0.40
codegen_flags: <defaults>
</compile_context>

<pallas_src>
import jax
import jax.numpy as jnp
from jax.experimental import pallas as pl
from jax.experimental.pallas import tpu as pltpu


def _round_up(x, m):
    return ((x + m - 1) // m) * m


def critic_kernel(s_ref, a_ref, w1s_ref, w1a_ref, b1_ref, w2_ref, b2_ref,
                  w3_ref, b3_ref, o_ref):
    # Layer 1: split-input matmul replaces concat([state, action]) @ W1.
    h1 = (jnp.dot(s_ref[...], w1s_ref[...], preferred_element_type=jnp.float32)
          + jnp.dot(a_ref[...], w1a_ref[...], preferred_element_type=jnp.float32)
          + b1_ref[...])
    h1 = jnp.maximum(h1, 0.0)                                   # f32 epilogue (VPU)

    # Layer 2.
    h2 = jnp.dot(h1.astype(w2_ref.dtype), w2_ref[...],
                 preferred_element_type=jnp.float32) + b2_ref[...]
    h2 = jnp.maximum(h2, 0.0)

    # Layer 3: natural (TB, H) x (H, 1) matmul, f32 operands (tiny), scalar b3
    # read from SMEM.
    q = jnp.dot(h2, w3_ref[...], preferred_element_type=jnp.float32) + b3_ref[0, 0]
    o_ref[...] = q.astype(o_ref.dtype)


def critic_forward(state, action, params, *, block_batch=2048,
                   matmul_dtype=jnp.bfloat16):
    """state: (B, n_obs), action: (B, act_dim) -> (B, 1) float32.

    block_batch: max batch tile (streaming/M dimension, not tied to the MXU
                 edge); bigger tiles amortize the ~0.35us per-grid-step cost.
    matmul_dtype: operand dtype for layers 1-2 (bf16 default on every
                  generation); accumulation and the ReLU/bias epilogue are f32.
    """
    w1s, w1a, b1, w2, b2, w3, b3 = params
    B, n_obs = state.shape
    act_dim = action.shape[1]
    H = w2.shape[0]
    d_in = n_obs + act_dim

    # --- Batch tile selection -------------------------------------------------
    assert block_batch % 128 == 0, "block_batch must be a multiple of 128"
    if B <= 256:
        tb = _round_up(B, 8)                       # single grid step
    else:
        # >= 2 grid steps so v7x can balance both TensorCores; cap at block_batch.
        tb = min(block_batch, _round_up(pl.cdiv(B, 2), 128))
    b_pad = _round_up(B, tb)

    # --- Cast (once) BEFORE padding; skip padding entirely when possible -----
    state = state.astype(matmul_dtype)
    action = action.astype(matmul_dtype)
    if b_pad != B:
        state = jnp.pad(state, ((0, b_pad - B), (0, 0)))
        action = jnp.pad(action, ((0, b_pad - B), (0, 0)))
    w1s = w1s.astype(matmul_dtype)
    w1a = w1a.astype(matmul_dtype)
    w2 = w2.astype(matmul_dtype)

    def resident(shape):
        # Full-array block with a constant index map -> stays VMEM-resident.
        return pl.BlockSpec(shape, lambda i, _s=shape: (0,) * len(_s))

    bpe = jnp.dtype(matmul_dtype).itemsize
    cost = pl.CostEstimate(
        flops=2 * b_pad * (d_in * H + H * H + H),
        transcendentals=0,
        bytes_accessed=(b_pad * d_in * bpe            # state/action tiles
                        + (d_in * H + H * H) * bpe    # w1, w2
                        + (2 * H + H + 1) * 4         # b1, b2, w3, b3
                        + b_pad * 4))                 # output

    out = pl.pallas_call(
        critic_kernel,
        out_shape=jax.ShapeDtypeStruct((b_pad, 1), jnp.float32),
        grid_spec=pltpu.PrefetchScalarGridSpec(
            num_scalar_prefetch=0,
            grid=(b_pad // tb,),
            in_specs=[
                pl.BlockSpec((tb, n_obs), lambda i: (i, 0)),    # state tile
                pl.BlockSpec((tb, act_dim), lambda i: (i, 0)),  # action tile
                resident((n_obs, H)),                           # w1_s
                resident((act_dim, H)),                         # w1_a
                resident((1, H)),                               # b1
                resident((H, H)),                               # w2
                resident((1, H)),                               # b2
                resident((H, 1)),                               # w3 (column)
                pl.BlockSpec(memory_space=pltpu.MemorySpace.SMEM),  # b3 scalar
            ],
            out_specs=pl.BlockSpec((tb, 1), lambda i: (i, 0)),
        ),
        compiler_params=pltpu.CompilerParams(
            dimension_semantics=("parallel",)),      # v7x: shard batch over 2 TCs
        cost_estimate=cost,
    )(state, action, w1s, w1a, b1, w2, b2, w3, b3)

    return out[:B]


def init_params(key, n_obs, output_dim, hidden_size, init_w=0.003):
    """Matches PyTorch nn.Linear defaults (uniform +/-1/sqrt(fan_in)), with
    linear3 overridden to uniform +/-init_w.  Stored kernel-side layout:
    W1 split along the input dim; W3 kept as an (H, 1) column."""
    k = jax.random.split(key, 6)
    d_in = n_obs + output_dim

    def uni(kk, shape, bound):
        return jax.random.uniform(kk, shape, jnp.float32, -bound, bound)

    bound1 = 1.0 / float(d_in) ** 0.5
    w1 = uni(k[0], (d_in, hidden_size), bound1)
    b1 = uni(k[1], (1, hidden_size), bound1)
    bound2 = 1.0 / float(hidden_size) ** 0.5
    w2 = uni(k[2], (hidden_size, hidden_size), bound2)
    b2 = uni(k[3], (1, hidden_size), bound2)
    w3 = uni(k[4], (hidden_size, 1), init_w)
    b3 = uni(k[5], (1, 1), init_w)

    w1_s, w1_a = w1[:n_obs], w1[n_obs:]
    return (w1_s, w1_a, b1, w2, b2, w3, b3)


def critic_reference(state, action, params, matmul_dtype=jnp.bfloat16):
    """Pure-JAX reference of the same math (concat form, same dtype policy)."""
    w1s, w1a, b1, w2, b2, w3, b3 = params
    x = jnp.concatenate([state, action], axis=1).astype(matmul_dtype)
    w1 = jnp.concatenate([w1s, w1a], axis=0).astype(matmul_dtype)
    h = jnp.maximum(jnp.dot(x, w1, preferred_element_type=jnp.float32) + b1, 0.0)
    h = jnp.maximum(jnp.dot(h.astype(matmul_dtype), w2.astype(matmul_dtype),
                            preferred_element_type=jnp.float32) + b2, 0.0)
    return jnp.dot(h, w3, preferred_element_type=jnp.float32) + b3


if __name__ == "__main__":
    n_obs, act_dim, hidden_size = 16, 4, 32
    key = jax.random.PRNGKey(0)
    k_s, k_a, k_p = jax.random.split(key, 3)
    params = init_params(k_p, n_obs, act_dim, hidden_size)

    # Case 1: tiny batch (single grid step), explicit f32 operands.
    state = jax.random.normal(k_s, (8, n_obs), jnp.float32)
    action = jax.random.normal(k_a, (8, act_dim), jnp.float32)
    q = jax.block_until_ready(
        critic_forward(state, action, params, matmul_dtype=jnp.float32))
    ref = critic_reference(state, action, params, matmul_dtype=jnp.float32)
    assert q.shape == (8, 1)
    assert jnp.allclose(q, ref, atol=1e-4, rtol=1e-4), \
        float(jnp.max(jnp.abs(q - ref)))

    # Case 2: gridded batch (>=2 tiles), default bf16 operands / f32 accum.
    state2 = jax.random.normal(k_s, (512, n_obs), jnp.float32)
    action2 = jax.random.normal(k_a, (512, act_dim), jnp.float32)
    q2 = jax.block_until_ready(critic_forward(state2, action2, params))
    ref2 = critic_reference(state2, action2, params)
    assert q2.shape == (512, 1)
    assert jnp.allclose(q2, ref2, atol=2e-2, rtol=2e-2), \
        float(jnp.max(jnp.abs(q2 - ref2)))

    # Case 3: ragged batch (exercises cast-before-pad tail path), bf16 default.
    state3 = jax.random.normal(k_s, (300, n_obs), jnp.float32)
    action3 = jax.random.normal(k_a, (300, act_dim), jnp.float32)
    q3 = jax.block_until_ready(critic_forward(state3, action3, params))
    ref3 = critic_reference(state3, action3, params)
    assert q3.shape == (300, 1)
    assert jnp.allclose(q3, ref3, atol=2e-2, rtol=2e-2), \
        float(jnp.max(jnp.abs(q3 - ref3)))

    print("KERNEL_OK")
</pallas_src>

<mosaic_0001>
module attributes {stable_mosaic.version = 11 : i64} {
  func.func @critic_kernel(%arg0: i32, %arg1: memref<8x16xf32, #tpu.memory_space<vmem>>, %arg2: memref<8x4xf32, #tpu.memory_space<vmem>>, %arg3: memref<16x32xf32, #tpu.memory_space<vmem>>, %arg4: memref<4x32xf32, #tpu.memory_space<vmem>>, %arg5: memref<1x32xf32, #tpu.memory_space<vmem>>, %arg6: memref<32x32xf32, #tpu.memory_space<vmem>>, %arg7: memref<1x32xf32, #tpu.memory_space<vmem>>, %arg8: memref<32x1xf32, #tpu.memory_space<vmem>>, %arg9: memref<1x1xf32, #tpu.memory_space<smem>>, %arg10: memref<8x1xf32, #tpu.memory_space<vmem>>) attributes {dimension_semantics = [#tpu.dimension_semantics<parallel>], iteration_bounds = array<i64: 1>, scalar_prefetch = 0 : i64, scratch_operands = 0 : i64, tpu.core_type = #tpu.core_type<tc>, window_params = [{transform_indices = @transform_0, window_bounds = array<i64: 8, 16>}, {transform_indices = @transform_1, window_bounds = array<i64: 8, 4>}, {pipeline_mode = #tpu.pipeline_mode<synchronous>, transform_indices = @transform_2, window_bounds = array<i64: 16, 32>}, {pipeline_mode = #tpu.pipeline_mode<synchronous>, transform_indices = @transform_3, window_bounds = array<i64: 4, 32>}, {pipeline_mode = #tpu.pipeline_mode<synchronous>, transform_indices = @transform_4, window_bounds = array<i64: 1, 32>}, {pipeline_mode = #tpu.pipeline_mode<synchronous>, transform_indices = @transform_5, window_bounds = array<i64: 32, 32>}, {pipeline_mode = #tpu.pipeline_mode<synchronous>, transform_indices = @transform_6, window_bounds = array<i64: 1, 32>}, {pipeline_mode = #tpu.pipeline_mode<synchronous>, transform_indices = @transform_7, window_bounds = array<i64: 32, 1>}, {transform_indices = @transform_8, window_bounds = array<i64: 1, 1>}, {transform_indices = @transform_9, window_bounds = array<i64: 8, 1>}]} {
    %c0 = arith.constant 0 : index
    %c0_0 = arith.constant 0 : index
    %0 = vector.load %arg1[%c0, %c0_0] : memref<8x16xf32, #tpu.memory_space<vmem>>, vector<8x16xf32>
    %c0_1 = arith.constant 0 : index
    %c0_2 = arith.constant 0 : index
    %1 = vector.load %arg3[%c0_1, %c0_2] : memref<16x32xf32, #tpu.memory_space<vmem>>, vector<16x32xf32>
    %cst = arith.constant dense<0.000000e+00> : vector<8x32xf32>
    %2 = tpu.matmul %0, %1, %cst {dimension_numbers = #tpu.dot_dimension_numbers<[1], [0], [0], [1], [0, 0, 1, 1], [], []>} : vector<8x16xf32>, vector<16x32xf32>, vector<8x32xf32> -> vector<8x32xf32>
    %c0_3 = arith.constant 0 : index
    %c0_4 = arith.constant 0 : index
    %3 = vector.load %arg2[%c0_3, %c0_4] : memref<8x4xf32, #tpu.memory_space<vmem>>, vector<8x4xf32>
    %c0_5 = arith.constant 0 : index
    %c0_6 = arith.constant 0 : index
    %4 = vector.load %arg4[%c0_5, %c0_6] : memref<4x32xf32, #tpu.memory_space<vmem>>, vector<4x32xf32>
    %cst_7 = arith.constant dense<0.000000e+00> : vector<8x32xf32>
    %5 = tpu.matmul %3, %4, %cst_7 {dimension_numbers = #tpu.dot_dimension_numbers<[1], [0], [0], [1], [0, 0, 1, 1], [], []>} : vector<8x4xf32>, vector<4x32xf32>, vector<8x32xf32> -> vector<8x32xf32>
    %6 = arith.addf %2, %5 : vector<8x32xf32>
    %c0_8 = arith.constant 0 : index
    %c0_9 = arith.constant 0 : index
    %7 = vector.load %arg5[%c0_8, %c0_9] : memref<1x32xf32, #tpu.memory_space<vmem>>, vector<1x32xf32>
    %8 = vector.broadcast %7 : vector<1x32xf32> to vector<8x32xf32>
    %9 = arith.addf %6, %8 : vector<8x32xf32>
    %cst_10 = arith.constant 0.000000e+00 : f32
    %10 = vector.broadcast %cst_10 : f32 to vector<8x32xf32>
    %11 = arith.maximumf %9, %10 : vector<8x32xf32>
    %c0_11 = arith.constant 0 : index
    %c0_12 = arith.constant 0 : index
    %12 = vector.load %arg6[%c0_11, %c0_12] : memref<32x32xf32, #tpu.memory_space<vmem>>, vector<32x32xf32>
    %cst_13 = arith.constant dense<0.000000e+00> : vector<8x32xf32>
    %13 = tpu.matmul %11, %12, %cst_13 {dimension_numbers = #tpu.dot_dimension_numbers<[1], [0], [0], [1], [0, 0, 1, 1], [], []>} : vector<8x32xf32>, vector<32x32xf32>, vector<8x32xf32> -> vector<8x32xf32>
    %c0_14 = arith.constant 0 : index
    %c0_15 = arith.constant 0 : index
    %14 = vector.load %arg7[%c0_14, %c0_15] : memref<1x32xf32, #tpu.memory_space<vmem>>, vector<1x32xf32>
    %15 = vector.broadcast %14 : vector<1x32xf32> to vector<8x32xf32>
    %16 = arith.addf %13, %15 : vector<8x32xf32>
    %cst_16 = arith.constant 0.000000e+00 : f32
    %17 = vector.broadcast %cst_16 : f32 to vector<8x32xf32>
    %18 = arith.maximumf %16, %17 : vector<8x32xf32>
    %c0_17 = arith.constant 0 : index
    %c0_18 = arith.constant 0 : index
    %19 = vector.load %arg8[%c0_17, %c0_18] : memref<32x1xf32, #tpu.memory_space<vmem>>, vector<32x1xf32>
    %cst_19 = arith.constant dense<0.000000e+00> : vector<8x1xf32>
    %20 = tpu.matmul %18, %19, %cst_19 {dimension_numbers = #tpu.dot_dimension_numbers<[1], [0], [0], [1], [0, 0, 1, 1], [], []>} : vector<8x32xf32>, vector<32x1xf32>, vector<8x1xf32> -> vector<8x1xf32>
    %c0_20 = arith.constant 0 : index
    %c0_21 = arith.constant 0 : index
    %21 = memref.load %arg9[%c0_20, %c0_21] : memref<1x1xf32, #tpu.memory_space<smem>>
    %22 = vector.broadcast %21 : f32 to vector<8x1xf32>
    %23 = arith.addf %20, %22 : vector<8x1xf32>
    %c0_22 = arith.constant 0 : index
    %c0_23 = arith.constant 0 : index
    %24 = vector.load %arg10[%c0_22, %c0_23] : memref<8x1xf32, #tpu.memory_space<vmem>>, vector<8x1xf32>
    tpu.vector_store %arg10[%c0_22, %c0_23], %23 {strides = array<i32>} : memref<8x1xf32, #tpu.memory_space<vmem>>, vector<8x1xf32>,
    return
  }
  func.func @transform_0(%arg0: i32) -> (i32, i32) {
    %c0_i32 = arith.constant 0 : i32
    %c0_i32_0 = arith.constant 0 : i32
    return %arg0, %c0_i32 : i32, i32
  }
  func.func @transform_1(%arg0: i32) -> (i32, i32) {
    %c0_i32 = arith.constant 0 : i32
    %c0_i32_0 = arith.constant 0 : i32
    return %arg0, %c0_i32 : i32, i32
  }
  func.func @transform_2(%arg0: i32) -> (i32, i32) {
    %c0_i32 = arith.constant 0 : i32
    %c0_i32_0 = arith.constant 0 : i32
    %c0_i32_1 = arith.constant 0 : i32
    return %c0_i32, %c0_i32_0 : i32, i32
  }
  func.func @transform_3(%arg0: i32) -> (i32, i32) {
    %c0_i32 = arith.constant 0 : i32
    %c0_i32_0 = arith.constant 0 : i32
    %c0_i32_1 = arith.constant 0 : i32
    return %c0_i32, %c0_i32_0 : i32, i32
  }
  func.func @transform_4(%arg0: i32) -> (i32, i32) {
    %c0_i32 = arith.constant 0 : i32
    %c0_i32_0 = arith.constant 0 : i32
    %c0_i32_1 = arith.constant 0 : i32
    return %c0_i32, %c0_i32_0 : i32, i32
  }
  func.func @transform_5(%arg0: i32) -> (i32, i32) {
    %c0_i32 = arith.constant 0 : i32
    %c0_i32_0 = arith.constant 0 : i32
    %c0_i32_1 = arith.constant 0 : i32
    return %c0_i32, %c0_i32_0 : i32, i32
  }
  func.func @transform_6(%arg0: i32) -> (i32, i32) {
    %c0_i32 = arith.constant 0 : i32
    %c0_i32_0 = arith.constant 0 : i32
    %c0_i32_1 = arith.constant 0 : i32
    return %c0_i32, %c0_i32_0 : i32, i32
  }
  func.func @transform_7(%arg0: i32) -> (i32, i32) {
    %c0_i32 = arith.constant 0 : i32
    %c0_i32_0 = arith.constant 0 : i32
    %c0_i32_1 = arith.constant 0 : i32
    return %c0_i32, %c0_i32_0 : i32, i32
  }
  func.func @transform_8(%arg0: i32) -> (i32, i32) {
    %c0_i32 = arith.constant 0 : i32
    %c0_i32_0 = arith.constant 0 : i32
    %c0_i32_1 = arith.constant 0 : i32
    return %c0_i32, %c0_i32_0 : i32, i32
  }
  func.func @transform_9(%arg0: i32) -> (i32, i32) {
    %c0_i32 = arith.constant 0 : i32
    %c0_i32_0 = arith.constant 0 : i32
    return %arg0, %c0_i32 : i32, i32
  }
}

</mosaic_0001>

<bundles_post_ra>
// kernel: tpu_custom_call.1
= control target key start
LH: loop header
LB: loop body
LE: loop exit
PB: predicated region body
PF: predicated region fallthrough
CT: control target
= control target key end

     0   :  { %15 = vsyncpa [#allocation4], 0  ;;  %s358_s0 = inlined_call_operand.hbm [shape: f32[8,16], index: 0, kind: input, shape index: {}]   ;;  %s359_s1 = inlined_call_operand.vmem [shape: f32[8,4], index: 1, kind: input, shape index: {}]   ;;  %s360_s2 = inlined_call_operand.vmem [shape: f32[16,32], index: 2, kind: input, shape index: {}]   ;;  %s361_s3 = inlined_call_operand.hbm [shape: f32[4,32], index: 3, kind: input, shape index: {}]   ;;  %s362_s4 = inlined_call_operand.vmem [shape: f32[1,32], index: 4, kind: input, shape index: {}]   ;;  %s363_s5 = inlined_call_operand.vmem [shape: f32[32,32], index: 5, kind: input, shape index: {}]   ;;  %s364_s6 = inlined_call_operand.vmem [shape: f32[1,32], index: 6, kind: input, shape index: {}]   ;;  %s365_s7 = inlined_call_operand.vmem [shape: f32[32,1], index: 7, kind: input, shape index: {}]   ;;  %s366_s8 = inlined_call_operand.<no memory space> [shape: f32[1,1], index: 8, kind: input, shape index: {}]   ;;  %s367_s9 = inlined_call_operand.vmem [shape: f32[8,1], index: 9, kind: output, shape index: {}]  }
   0x1   :  { %s22_s11 = sshll.u32 %s358_s0, 4  ;;  %s23_s11 = int_to_ptr.hbm [resolvable:$true] %s22_s11 }
   0x2   :  { %16 = vsyncpa [#allocation6], 0  ;;  %s255_s12 = smov [#allocation3]   ;;  %s37_s16 = sshll.u32 %s361_s3, 4  ;;  %s38_s16 = int_to_ptr.hbm [resolvable:$true] %s37_s16 }
   0x3   :  { %s24_s13 = sshll.u32 %s255_s12, 4  ;;  %s256_s17 = smov [#allocation5]   ;;  %s25_s13 = int_to_ptr.vmem [resolvable:$true] %s24_s13 }
   0x4   :  { %27 = dma.hbm_to_vmem [thread:$0]  %s23_s11, 128, %s25_s13, [#allocation4]  }
   0x5   :  { %s39_s18 = sshll.u32 %s256_s17, 4  ;;  %s40_s18 = int_to_ptr.vmem [resolvable:$true] %s39_s18 }
   0x6   :  { %42 = dma.hbm_to_vmem [thread:$0]  %s38_s16, 64, %s40_s18, [#allocation6]  }
   0x7   :  { %251 = dma.done.wait [#allocation4], 128  }
   0x8   :  { %252 = vsyncadd [#allocation4], 4294967168 }
   0x9   :  { %253 = dma.done.wait [#allocation6], 64  }
   0xa   :  { %254 = vsyncadd [#allocation6], 4294967232  ;;  %vm70_vm0 = vcmask 1043456   ;;  %vm66_vm1 = vcmask 31744   ;;  %v63_v0 = vld [vmem:[%s360_s2 + $0x8] sm:$0xff]  ;;  %v62_v2 = vld [vmem:[%s360_s2] sm:$0xff]  ;;  %v162_v23 = vstv %s366_s8 }
   0xb   :  { %v65_v1 = vld [vmem:[#allocation5] sm:$0xf]  ;;  %112 = vmatpush.msra.mxu1 %v63_v0  ;;  %v64_v3 = vld [vmem:[%s359_s1] sm:$0xff]  ;;  %vm94_vm2 = vcmask 130048   ;;  %v127_v5 = vld [vmem:[%s363_s5 + $0x18] sm:$0xff]  ;;  %vm132_vm3 = vcmask 261120  }
   0xc   :  { %194 = vmatpush.msk.msra.mxu0 %vm70_vm0, %v65_v1  ;;  %v61_v4 = vld [vmem:[#allocation3] sm:$0xff]  ;;  %148 = vmatpush.msra.mxu2 %v127_v5  ;;  %v126_v6 = vld [vmem:[%s363_s5 + $0x10] sm:$0xff]  ;;  %v125_v7 = vld [vmem:[%s363_s5 + $0x8] sm:$0xff]  ;;  %vm186_vm4 = vcmask 7168  }
   0xd   :  { %195 = vmatmul.msk.f32.vlgmr.msra.gmra.mxu0 %vm66_vm1, %v64_v3  ;;  %113 = vmatpush.msra.mxu1 %v62_v2  ;;  %v124_v8 = vld [vmem:[%s363_s5] sm:$0xff]  ;;  %v160_v9 = vld [vmem:[%s365_s7 + $0x18] sm:$0xff]  ;;  %v159_v16 = vld [vmem:[%s365_s7 + $0x10] sm:$0xff] }
   0xe   :  { %196 = vmatmul.msk.f32.vlgmr.msra.gmra.mxu1 %vm94_vm2, %v61_v4  ;;  %149 = vmatpush.msra.mxu2 %v126_v6  ;;  %v201_v11 = vld [vmem:[%s362_s4] ss:$0 sm:$0xff]  ;;  %v158_v17 = vld [vmem:[%s365_s7 + $0x8] sm:$0xff] }
   0xf   :  { %178 = vmatpush.msra.mxu3 %v160_v9  ;;  %v157_v18 = vld [vmem:[%s365_s7] sm:$0xff] }
  0x10   :  { %150 = vmatpush.msra.mxu2 %v125_v7  ;;  %v202_v19 = vld [vmem:[%s364_s6] ss:$0 sm:$0xff] }
  0x11   :  { %179 = vmatpush.msra.mxu3 %v159_v16 }
  0x12   :  { %151 = vmatpush.msra.mxu2 %v124_v8 }
  0x13   :  { %180 = vmatpush.msra.mxu3 %v158_v17 }
  0x15   :  { %181 = vmatpush.msra.mxu3 %v157_v18 }
  0x8a   :  { %v91_v10 = vpop.f32.mrf.mxu0 }
  0x8b   :  { %v115_v12 = vpop.f32.mrf.mxu1 }
  0x8c   :  { %v116_v13 = vadd.f32 %v115_v12, %v91_v10 }
  0x8e   :  { %v122_v14 = vadd.f32 %v201_v11, %v116_v13 }
  0x90   :  { %v123_v15 = vmax.f32 %v122_v14, 0.0 }
  0x92   :  { %197 = vmatmul.msk.f32.vlgmr.msra.gmra.mxu2 %vm132_vm3, %v123_v15 }
 0x115   :  { %v153_v20 = vpop.f32.mrf.mxu2 }
 0x116   :  { %v154_v21 = vadd.f32 %v202_v19, %v153_v20 }
 0x118   :  { %v156_v22 = vmax.f32 %v154_v21, 0.0 }
 0x11a   :  { %198 = vmatmul.msk.f32.vlgmr.msra.gmra.mxu3 %vm132_vm3, %v156_v22 }
 0x19d   :  { %v183_v24 = vpop.f32.mrf.mxu3 }
 0x19e   :  { %v184_v25 = vadd.f32 %v183_v24, %v162_v23 }
 0x1a0   :  { %187 = vst.msk [vmem:[%s367_s9] sm:$0xff] %vm186_vm4, %v184_v25 }
 0x1a1   :  { %192 = vsyncpa [#allocation4], 1 }
 0x1a2   :  { %193 = vsyncpa [#allocation6], 1 }

</bundles_post_ra>
